<compile_context>
chip_gen: v7x
topology: tpu7x:2x2x1
jax: 0.10.0
libtpu: 0.0.40
codegen_flags: <defaults>
</compile_context>

<pallas_src>
import jax
import jax.numpy as jnp
from jax.experimental import pallas as pl
from jax.experimental.pallas import tpu as pltpu

LANE = 128
SUBLANE = 8
BN_EPS = 1e-5


def _round_up(n, m):
    return ((n + m - 1) // m) * m


def _choose_batch_tile(B, batch_tile):
    """Pick (tile_rows, n_tiles) for the batch grid axis."""
    if B <= batch_tile:
        # Single block spanning the full batch: block dim == array dim, so no
        # sublane-divisibility constraint and no padding DMA is needed.
        return B, 1
    # Several tiles: keep the tile a multiple of 8 (sublane) and aim for an even
    # tile count so both v7x TensorCores get balanced work under ("parallel",).
    n = pl.cdiv(B, batch_tile)
    if n % 2:
        n += 1
    tb = _round_up(pl.cdiv(B, n), SUBLANE)
    return tb, pl.cdiv(B, tb)


# ----------------------------------------------------------------------------- kernel
def _mlp_kernel(x_ref, w1_ref, b1_ref, w2_ref, b2_ref, w3_ref, b3_ref, o_ref):
    # Cast x in-kernel (cheap VPU op, hides under MXU; avoids an extra HBM pass).
    x = x_ref[...].astype(w1_ref.dtype)

    # fc1 (+ folded bn1) -> poly
    h = jnp.dot(x, w1_ref[...], preferred_element_type=jnp.float32)
    h = h + b1_ref[...]
    h = h * (0.25 * h + 0.5)            # 0.5*h + 0.25*h^2, reassociated

    # fc2 (+ folded bn2) -> poly
    h = jnp.dot(h.astype(w2_ref.dtype), w2_ref[...],
                preferred_element_type=jnp.float32)
    h = h + b2_ref[...]
    h = h * (0.25 * h + 0.5)

    # fc3 (lane-padded output columns); store in o_ref.dtype (bf16 by default).
    o = jnp.dot(h.astype(w3_ref.dtype), w3_ref[...],
                preferred_element_type=jnp.float32)
    o_ref[...] = (o + b3_ref[...]).astype(o_ref.dtype)


# ----------------------------------------------------------------------------- wrapper
def fhe_mlp_forward(x, kernel_params, num_classes, *, batch_tile=2048,
                    store_dtype=jnp.bfloat16):
    """Forward pass. x: (B, input_dim). Returns (B, num_classes) f32."""
    w1, b1, w2, b2, w3, b3 = kernel_params
    B, K = x.shape
    c_pad = w3.shape[1]

    tb, n_tiles = _choose_batch_tile(B, batch_tile)

    def resident(shape):
        # Constant index_map -> weights/biases stay VMEM-resident across steps.
        return pl.BlockSpec(shape, lambda i: tuple(0 for _ in shape))

    out = pl.pallas_call(
        _mlp_kernel,
        out_shape=jax.ShapeDtypeStruct((B, c_pad), store_dtype),
        grid=(n_tiles,),
        in_specs=[
            pl.BlockSpec((tb, K), lambda i: (i, 0)),   # x: tiled over batch
            resident(w1.shape), resident(b1.shape),
            resident(w2.shape), resident(b2.shape),
            resident(w3.shape), resident(b3.shape),
        ],
        out_specs=pl.BlockSpec((tb, c_pad), lambda i: (i, 0)),
        compiler_params=pltpu.CompilerParams(
            dimension_semantics=("parallel",),
            vmem_limit_bytes=64 << 20),
    )(x, w1, b1, w2, b2, w3, b3)

    return out[:B, :num_classes].astype(jnp.float32)


# ----------------------------------------------------------------------------- params
def xavier_uniform(key, fan_out, fan_in):
    # matches torch.nn.init.xavier_uniform_ on a (fan_out, fan_in) weight
    a = (6.0 / (fan_in + fan_out)) ** 0.5
    return jax.random.uniform(key, (fan_out, fan_in), jnp.float32, -a, a)


def make_torch_params(key, input_dim, num_classes):
    """PyTorch-convention params of FHEFriendlyMLPClassifier (inference-mode BN stats)."""
    k1, k2, k3 = jax.random.split(key, 3)

    def bn_stats(dim):
        return dict(gamma=jnp.ones((dim,), jnp.float32),
                    beta=jnp.zeros((dim,), jnp.float32),
                    mean=jnp.zeros((dim,), jnp.float32),
                    var=jnp.ones((dim,), jnp.float32))

    return dict(
        w1=xavier_uniform(k1, 256, input_dim), b1=jnp.zeros((256,), jnp.float32),
        bn1=bn_stats(256),
        w2=xavier_uniform(k2, 128, 256), b2=jnp.zeros((128,), jnp.float32),
        bn2=bn_stats(128),
        w3=xavier_uniform(k3, num_classes, 128), b3=jnp.zeros((num_classes,), jnp.float32),
    )


def prepare_kernel_params(p, compute_dtype=jnp.bfloat16):
    """Fold BN into fc1/fc2, transpose to (in, out), lane-pad fc3, cast weights to bf16."""
    def fold(w, b, bn):
        s = bn["gamma"] / jnp.sqrt(bn["var"] + BN_EPS)
        t = bn["beta"] - bn["mean"] * s
        wf = w.T * s[None, :]          # (in, out) with per-output-column scale
        bf = b * s + t
        return wf, bf

    w1, b1 = fold(p["w1"], p["b1"], p["bn1"])
    w2, b2 = fold(p["w2"], p["b2"], p["bn2"])

    w3 = p["w3"].T                     # (128, num_classes)
    b3 = p["b3"]
    num_classes = w3.shape[1]
    c_pad = _round_up(max(num_classes, LANE), LANE)
    w3p = jnp.zeros((w3.shape[0], c_pad), jnp.float32).at[:, :num_classes].set(w3)
    b3p = jnp.zeros((c_pad,), jnp.float32).at[:num_classes].set(b3)

    kernel_params = (
        w1.astype(compute_dtype), b1[None, :].astype(jnp.float32),
        w2.astype(compute_dtype), b2[None, :].astype(jnp.float32),
        w3p.astype(compute_dtype), b3p[None, :].astype(jnp.float32),
    )
    return kernel_params, num_classes


# ----------------------------------------------------------------------------- references
def reference_forward_module(x, p):
    """Pure-JAX f32 reference matching the PyTorch module (eval-mode BN)."""
    def bn(h, q):
        s = q["gamma"] / jnp.sqrt(q["var"] + BN_EPS)
        t = q["beta"] - q["mean"] * s
        return h * s + t

    def poly(h):
        return 0.5 * h + 0.25 * h * h

    h = x @ p["w1"].T + p["b1"]
    h = poly(bn(h, p["bn1"]))
    h = h @ p["w2"].T + p["b2"]
    h = poly(bn(h, p["bn2"]))
    return h @ p["w3"].T + p["b3"]


def reference_forward_kernel_math(x, kernel_params, num_classes,
                                  store_dtype=jnp.bfloat16):
    """Pure-JAX reference using the exact same folded/bf16 params + final store cast."""
    w1, b1, w2, b2, w3, b3 = kernel_params
    h = jnp.dot(x.astype(w1.dtype), w1, preferred_element_type=jnp.float32) + b1
    h = h * (0.25 * h + 0.5)
    h = jnp.dot(h.astype(w2.dtype), w2, preferred_element_type=jnp.float32) + b2
    h = h * (0.25 * h + 0.5)
    o = jnp.dot(h.astype(w3.dtype), w3, preferred_element_type=jnp.float32) + b3
    o = o.astype(store_dtype).astype(jnp.float32)
    return o[:, :num_classes]


# ----------------------------------------------------------------------------- demo
if __name__ == "__main__":
    key = jax.random.PRNGKey(0)
    kx, kx2, kp = jax.random.split(key, 3)

    batch = 2
    input_dim = 32
    num_classes = 10

    x = jax.random.normal(kx, (batch, input_dim), jnp.float32)
    torch_params = make_torch_params(kp, input_dim, num_classes)
    kernel_params, nc = prepare_kernel_params(torch_params)

    out = fhe_mlp_forward(x, kernel_params, nc)
    out = jax.block_until_ready(out)
    assert out.shape == (batch, num_classes)

    # Exact-math check against the same bf16/folded parameters (incl. bf16 store).
    ref_bf16 = reference_forward_kernel_math(x, kernel_params, nc)
    assert jnp.allclose(out, ref_bf16, atol=2e-2, rtol=1e-2), \
        f"mismatch vs bf16 reference: {jnp.max(jnp.abs(out - ref_bf16))}"

    # Semantic check against the original f32 module (loose tol for bf16 weights/output).
    ref_f32 = reference_forward_module(x, torch_params)
    assert jnp.allclose(out, ref_f32, atol=5e-2, rtol=5e-2), \
        f"mismatch vs f32 module reference: {jnp.max(jnp.abs(out - ref_f32))}"

    # Second check exercising the multi-tile / partial-last-block path (no jnp.pad).
    x2 = jax.random.normal(kx2, (20, input_dim), jnp.float32)
    out2 = jax.block_until_ready(fhe_mlp_forward(x2, kernel_params, nc, batch_tile=8))
    ref2 = reference_forward_kernel_math(x2, kernel_params, nc)
    assert out2.shape == (20, num_classes)
    assert jnp.allclose(out2, ref2, atol=2e-2, rtol=1e-2), \
        f"multi-tile mismatch vs bf16 reference: {jnp.max(jnp.abs(out2 - ref2))}"

    print("KERNEL_OK")
</pallas_src>

<mosaic_0001>
module attributes {stable_mosaic.version = 11 : i64} {
  func.func @_mlp_kernel(%arg0: i32, %arg1: memref<2x32xf32, #tpu.memory_space<vmem>>, %arg2: memref<32x256xbf16, #tpu.memory_space<vmem>>, %arg3: memref<1x256xf32, #tpu.memory_space<vmem>>, %arg4: memref<256x128xbf16, #tpu.memory_space<vmem>>, %arg5: memref<1x128xf32, #tpu.memory_space<vmem>>, %arg6: memref<128x128xbf16, #tpu.memory_space<vmem>>, %arg7: memref<1x128xf32, #tpu.memory_space<vmem>>, %arg8: memref<2x128xbf16, #tpu.memory_space<vmem>>) attributes {dimension_semantics = [#tpu.dimension_semantics<parallel>], iteration_bounds = array<i64: 1>, scalar_prefetch = 0 : i64, scratch_operands = 0 : i64, tpu.core_type = #tpu.core_type<tc>, window_params = [{transform_indices = @transform_0, window_bounds = array<i64: 2, 32>}, {pipeline_mode = #tpu.pipeline_mode<synchronous>, transform_indices = @transform_1, window_bounds = array<i64: 32, 256>}, {pipeline_mode = #tpu.pipeline_mode<synchronous>, transform_indices = @transform_2, window_bounds = array<i64: 1, 256>}, {pipeline_mode = #tpu.pipeline_mode<synchronous>, transform_indices = @transform_3, window_bounds = array<i64: 256, 128>}, {pipeline_mode = #tpu.pipeline_mode<synchronous>, transform_indices = @transform_4, window_bounds = array<i64: 1, 128>}, {pipeline_mode = #tpu.pipeline_mode<synchronous>, transform_indices = @transform_5, window_bounds = array<i64: 128, 128>}, {pipeline_mode = #tpu.pipeline_mode<synchronous>, transform_indices = @transform_6, window_bounds = array<i64: 1, 128>}, {transform_indices = @transform_7, window_bounds = array<i64: 2, 128>}]} {
    %c0 = arith.constant 0 : index
    %c0_0 = arith.constant 0 : index
    %0 = vector.load %arg1[%c0, %c0_0] : memref<2x32xf32, #tpu.memory_space<vmem>>, vector<2x32xf32>
    %1 = arith.truncf %0 : vector<2x32xf32> to vector<2x32xbf16>
    %c0_1 = arith.constant 0 : index
    %c0_2 = arith.constant 0 : index
    %2 = vector.load %arg2[%c0_1, %c0_2] : memref<32x256xbf16, #tpu.memory_space<vmem>>, vector<32x256xbf16>
    %cst = arith.constant dense<0.000000e+00> : vector<2x256xf32>
    %3 = tpu.matmul %1, %2, %cst {dimension_numbers = #tpu.dot_dimension_numbers<[1], [0], [0], [1], [0, 0, 1, 1], [], []>} : vector<2x32xbf16>, vector<32x256xbf16>, vector<2x256xf32> -> vector<2x256xf32>
    %c0_3 = arith.constant 0 : index
    %c0_4 = arith.constant 0 : index
    %4 = vector.load %arg3[%c0_3, %c0_4] : memref<1x256xf32, #tpu.memory_space<vmem>>, vector<1x256xf32>
    %5 = vector.broadcast %4 : vector<1x256xf32> to vector<2x256xf32>
    %6 = arith.addf %3, %5 : vector<2x256xf32>
    %cst_5 = arith.constant 2.500000e-01 : f32
    %7 = vector.broadcast %cst_5 : f32 to vector<2x256xf32>
    %8 = arith.mulf %7, %6 : vector<2x256xf32>
    %cst_6 = arith.constant 5.000000e-01 : f32
    %9 = vector.broadcast %cst_6 : f32 to vector<2x256xf32>
    %10 = arith.addf %8, %9 : vector<2x256xf32>
    %11 = arith.mulf %6, %10 : vector<2x256xf32>
    %12 = arith.truncf %11 : vector<2x256xf32> to vector<2x256xbf16>
    %c0_7 = arith.constant 0 : index
    %c0_8 = arith.constant 0 : index
    %13 = vector.load %arg4[%c0_7, %c0_8] : memref<256x128xbf16, #tpu.memory_space<vmem>>, vector<256x128xbf16>
    %cst_9 = arith.constant dense<0.000000e+00> : vector<2x128xf32>
    %14 = tpu.matmul %12, %13, %cst_9 {dimension_numbers = #tpu.dot_dimension_numbers<[1], [0], [0], [1], [0, 0, 1, 1], [], []>} : vector<2x256xbf16>, vector<256x128xbf16>, vector<2x128xf32> -> vector<2x128xf32>
    %c0_10 = arith.constant 0 : index
    %c0_11 = arith.constant 0 : index
    %15 = vector.load %arg5[%c0_10, %c0_11] : memref<1x128xf32, #tpu.memory_space<vmem>>, vector<1x128xf32>
    %16 = vector.broadcast %15 : vector<1x128xf32> to vector<2x128xf32>
    %17 = arith.addf %14, %16 : vector<2x128xf32>
    %cst_12 = arith.constant 2.500000e-01 : f32
    %18 = vector.broadcast %cst_12 : f32 to vector<2x128xf32>
    %19 = arith.mulf %18, %17 : vector<2x128xf32>
    %cst_13 = arith.constant 5.000000e-01 : f32
    %20 = vector.broadcast %cst_13 : f32 to vector<2x128xf32>
    %21 = arith.addf %19, %20 : vector<2x128xf32>
    %22 = arith.mulf %17, %21 : vector<2x128xf32>
    %23 = arith.truncf %22 : vector<2x128xf32> to vector<2x128xbf16>
    %c0_14 = arith.constant 0 : index
    %c0_15 = arith.constant 0 : index
    %24 = vector.load %arg6[%c0_14, %c0_15] : memref<128x128xbf16, #tpu.memory_space<vmem>>, vector<128x128xbf16>
    %cst_16 = arith.constant dense<0.000000e+00> : vector<2x128xf32>
    %25 = tpu.matmul %23, %24, %cst_16 {dimension_numbers = #tpu.dot_dimension_numbers<[1], [0], [0], [1], [0, 0, 1, 1], [], []>} : vector<2x128xbf16>, vector<128x128xbf16>, vector<2x128xf32> -> vector<2x128xf32>
    %c0_17 = arith.constant 0 : index
    %c0_18 = arith.constant 0 : index
    %26 = vector.load %arg7[%c0_17, %c0_18] : memref<1x128xf32, #tpu.memory_space<vmem>>, vector<1x128xf32>
    %27 = vector.broadcast %26 : vector<1x128xf32> to vector<2x128xf32>
    %28 = arith.addf %25, %27 : vector<2x128xf32>
    %29 = arith.truncf %28 : vector<2x128xf32> to vector<2x128xbf16>
    %c0_19 = arith.constant 0 : index
    %c0_20 = arith.constant 0 : index
    %30 = vector.load %arg8[%c0_19, %c0_20] : memref<2x128xbf16, #tpu.memory_space<vmem>>, vector<2x128xbf16>
    tpu.vector_store %arg8[%c0_19, %c0_20], %29 {strides = array<i32>} : memref<2x128xbf16, #tpu.memory_space<vmem>>, vector<2x128xbf16>,
    return
  }
  func.func @transform_0(%arg0: i32) -> (i32, i32) {
    %c0_i32 = arith.constant 0 : i32
    %c0_i32_0 = arith.constant 0 : i32
    return %arg0, %c0_i32 : i32, i32
  }
  func.func @transform_1(%arg0: i32) -> (i32, i32) {
    %c0_i32 = arith.constant 0 : i32
    %c0_i32_0 = arith.constant 0 : i32
    %c0_i32_1 = arith.constant 0 : i32
    return %c0_i32, %c0_i32_0 : i32, i32
  }
  func.func @transform_2(%arg0: i32) -> (i32, i32) {
    %c0_i32 = arith.constant 0 : i32
    %c0_i32_0 = arith.constant 0 : i32
    %c0_i32_1 = arith.constant 0 : i32
    return %c0_i32, %c0_i32_0 : i32, i32
  }
  func.func @transform_3(%arg0: i32) -> (i32, i32) {
    %c0_i32 = arith.constant 0 : i32
    %c0_i32_0 = arith.constant 0 : i32
    %c0_i32_1 = arith.constant 0 : i32
    return %c0_i32, %c0_i32_0 : i32, i32
  }
  func.func @transform_4(%arg0: i32) -> (i32, i32) {
    %c0_i32 = arith.constant 0 : i32
    %c0_i32_0 = arith.constant 0 : i32
    %c0_i32_1 = arith.constant 0 : i32
    return %c0_i32, %c0_i32_0 : i32, i32
  }
  func.func @transform_5(%arg0: i32) -> (i32, i32) {
    %c0_i32 = arith.constant 0 : i32
    %c0_i32_0 = arith.constant 0 : i32
    %c0_i32_1 = arith.constant 0 : i32
    return %c0_i32, %c0_i32_0 : i32, i32
  }
  func.func @transform_6(%arg0: i32) -> (i32, i32) {
    %c0_i32 = arith.constant 0 : i32
    %c0_i32_0 = arith.constant 0 : i32
    %c0_i32_1 = arith.constant 0 : i32
    return %c0_i32, %c0_i32_0 : i32, i32
  }
  func.func @transform_7(%arg0: i32) -> (i32, i32) {
    %c0_i32 = arith.constant 0 : i32
    %c0_i32_0 = arith.constant 0 : i32
    return %arg0, %c0_i32 : i32, i32
  }
}

</mosaic_0001>

<bundles_post_ra>
// kernel: tpu_custom_call.1
= control target key start
LH: loop header
LB: loop body
LE: loop exit
PB: predicated region body
PF: predicated region fallthrough
CT: control target
= control target key end

     0   :  { %12 = vsyncpa [#allocation3], 0  ;;  %s980_s0 = inlined_call_operand.hbm [shape: f32[2,32], index: 0, kind: input, shape index: {}]   ;;  %s981_s1 = inlined_call_operand.hbm [shape: bf16[32,256], index: 1, kind: input, shape index: {}]   ;;  %s982_s2 = inlined_call_operand.hbm [shape: f32[1,256], index: 2, kind: input, shape index: {}]   ;;  %s983_s3 = inlined_call_operand.hbm [shape: bf16[256,128], index: 3, kind: input, shape index: {}]   ;;  %s984_s4 = inlined_call_operand.hbm [shape: f32[1,128], index: 4, kind: input, shape index: {}]   ;;  %s985_s5 = inlined_call_operand.hbm [shape: bf16[128,128], index: 5, kind: input, shape index: {}]   ;;  %s986_s6 = inlined_call_operand.hbm [shape: f32[1,128], index: 6, kind: input, shape index: {}]   ;;  %s987_s7 = inlined_call_operand.hbm [shape: bf16[2,128], index: 7, kind: output, shape index: {}]  }
   0x1   :  { %13 = vsyncpa [#allocation6], 0 }
   0x2   :  { %14 = vsyncpa [#allocation9], 0 }
   0x3   :  { %15 = vsyncpa [#allocation12], 0 }
   0x4   :  { %16 = vsyncpa [#allocation4], 0  ;;  %s829_s24 = smov [#allocation5]   ;;  %s643_s28 = scalar_lea.hbm %s981_s1, 512 }
   0x5   :  { %s32_s25 = sshll.u32 %s829_s24, 4  ;;  %p644_p0 = scmp.ne.s32.totalorder %s981_s1, %s643_s28  ;;  %s33_s25 = int_to_ptr.vmem [resolvable:$true] %s32_s25 }
   0x6   :  { %p647_p1 = scmp.lt.u32.totalorder %s643_s28, %s981_s1 }
   0x8   :  { %p649_p2 = pnand %p647_p1, %p644_p0 }
   0xa   :  { %652 = shalt.err (!%p649_p2)
}
   0xb   :  { %s653_s10 = scalar_lea.vmem %s33_s25, 512  ;;  %p658_p4 = scmp.lt.s32.totalorder %s33_s25, %s33_s25 }
   0xc   :  { %p654_p3 = scmp.ne.s32.totalorder %s33_s25, %s653_s10  ;;  %p659_p5 = scmp.lt.s32.totalorder %s653_s10, %s653_s10 }
   0xe   :  { %p660_p6 = por %p659_p5, %p658_p4 }
  0x10   :  { %p661_p7 = pnand %p660_p6, %p654_p3 }
  0x12   :  { %664 = shalt.err (!%p661_p7)
}
  0x13   :  { %s830_s11 = smov 128   ;;  %s831_s12 = smov 8  }
  0x14   :  { %38 = dma.hbm_to_vmem [thread:$0]  %s981_s1, 512, %s33_s25, [#allocation6], %s830_s11, %s830_s11, %s831_s12  }
  0x15   :  { %s832_s15 = smov [#allocation8]   ;;  %s665_s19 = scalar_lea.hbm %s983_s3, 2048 }
  0x16   :  { %s54_s16 = sshll.u32 %s832_s15, 4  ;;  %p666_p8 = scmp.ne.s32.totalorder %s983_s3, %s665_s19  ;;  %s55_s16 = int_to_ptr.vmem [resolvable:$true] %s54_s16 }
  0x17   :  { %p669_p9 = scmp.lt.u32.totalorder %s665_s19, %s983_s3 }
  0x19   :  { %p671_p10 = pnand %p669_p9, %p666_p8 }
  0x1b   :  { %674 = shalt.err (!%p671_p10)
}
  0x1c   :  { %s675_s24 = scalar_lea.vmem %s55_s16, 2048  ;;  %p680_p12 = scmp.lt.s32.totalorder %s55_s16, %s55_s16 }
  0x1d   :  { %p676_p11 = scmp.ne.s32.totalorder %s55_s16, %s675_s24  ;;  %p681_p13 = scmp.lt.s32.totalorder %s675_s24, %s675_s24 }
  0x1f   :  { %p682_p0 = por %p681_p13, %p680_p12 }
  0x21   :  { %p683_p1 = pnand %p682_p0, %p676_p11 }
  0x23   :  { %686 = shalt.err (!%p683_p1)
}
  0x24   :  { %s833_s1 = smov 64   ;;  %s834_s25 = smov 4  }
  0x25   :  { %60 = dma.hbm_to_vmem [thread:$0]  %s983_s3, 2048, %s55_s16, [#allocation9], %s833_s1, %s833_s1, %s834_s25  }
  0x26   :  { %s835_s28 = smov [#allocation11]   ;;  %s836_s30 = smov [#allocation2]  }
  0x27   :  { %s76_s29 = sshll.u32 %s835_s28, 4  ;;  %s23_s8 = sshll.u32 %s836_s30, 4  ;;  %s77_s29 = int_to_ptr.vmem [resolvable:$true] %s76_s29  ;;  %s24_s8 = int_to_ptr.vmem [resolvable:$true] %s23_s8 }
  0x28   :  { %s687_s11 = scalar_lea.hbm %s985_s5, 1024 }
  0x29   :  { %p688_p2 = scmp.ne.s32.totalorder %s985_s5, %s687_s11  ;;  %p691_p3 = scmp.lt.u32.totalorder %s687_s11, %s985_s5 }
  0x2b   :  { %p693_p4 = pnand %p691_p3, %p688_p2 }
  0x2d   :  { %696 = shalt.err (!%p693_p4)
}
  0x2e   :  { %s697_s3 = scalar_lea.vmem %s77_s29, 1024  ;;  %p702_p6 = scmp.lt.s32.totalorder %s77_s29, %s77_s29 }
  0x2f   :  { %p698_p5 = scmp.ne.s32.totalorder %s77_s29, %s697_s3  ;;  %p703_p7 = scmp.lt.s32.totalorder %s697_s3, %s697_s3 }
  0x31   :  { %p704_p8 = por %p703_p7, %p702_p6 }
  0x33   :  { %p705_p9 = pnand %p704_p8, %p698_p5 }
  0x35   :  { %708 = shalt.err (!%p705_p9)
}
  0x36   :  { %82 = dma.hbm_to_vmem [thread:$0]  %s985_s5, 1024, %s77_s29, [#allocation12], %s833_s1, %s833_s1, %s834_s25  }
  0x37   :  { %s709_s20 = scalar_lea.hbm %s980_s0, 32 }
  0x38   :  { %p710_p10 = scmp.ne.s32.totalorder %s980_s0, %s709_s20  ;;  %p713_p11 = scmp.lt.u32.totalorder %s709_s20, %s980_s0 }
  0x3a   :  { %p715_p12 = pnand %p713_p11, %p710_p10 }
  0x3c   :  { %718 = shalt.err (!%p715_p12)
}
  0x3d   :  { %s719_s26 = scalar_lea.vmem %s24_s8, 32  ;;  %p724_p0 = scmp.lt.s32.totalorder %s24_s8, %s24_s8 }
  0x3e   :  { %p720_p13 = scmp.ne.s32.totalorder %s24_s8, %s719_s26  ;;  %p725_p1 = scmp.lt.s32.totalorder %s719_s26, %s719_s26 }
  0x40   :  { %p726_p2 = por %p725_p1, %p724_p0 }
  0x42   :  { %p727_p3 = pnand %p726_p2, %p720_p13 }
  0x44   :  { %730 = shalt.err (!%p727_p3)
}
  0x45   :  { %26 = dma.hbm_to_vmem [thread:$0]  %s980_s0, 32, %s24_s8, [#allocation3]  }
  0x46   :  { %s837_s25 = smov [#allocation7]   ;;  %s838_s28 = smov [#allocation10]  }
  0x47   :  { %s45_s27 = sshll.u32 %s837_s25, 4  ;;  %s67_s29 = sshll.u32 %s838_s28, 4  ;;  %s46_s27 = int_to_ptr.vmem [resolvable:$true] %s45_s27  ;;  %s68_s29 = int_to_ptr.vmem [resolvable:$true] %s67_s29 }
  0x48   :  { %s731_s10 = scalar_lea.hbm %s982_s2, 32 }
  0x49   :  { %p732_p4 = scmp.ne.s32.totalorder %s982_s2, %s731_s10  ;;  %p735_p5 = scmp.lt.u32.totalorder %s731_s10, %s982_s2 }
  0x4b   :  { %p737_p6 = pnand %p735_p5, %p732_p4 }
  0x4d   :  { %740 = shalt.err (!%p737_p6)
}
  0x4e   :  { %s741_s0 = scalar_lea.vmem %s46_s27, 32  ;;  %p746_p8 = scmp.lt.s32.totalorder %s46_s27, %s46_s27 }
  0x4f   :  { %p742_p7 = scmp.ne.s32.totalorder %s46_s27, %s741_s0  ;;  %p747_p9 = scmp.lt.s32.totalorder %s741_s0, %s741_s0 }
  0x51   :  { %p748_p10 = por %p747_p9, %p746_p8 }
  0x53   :  { %p749_p11 = pnand %p748_p10, %p742_p7 }
  0x55   :  { %752 = shalt.err (!%p749_p11)
}
  0x56   :  { %48 = dma.hbm_to_vmem [thread:$0]  %s982_s2, 32, %s46_s27, [#allocation6]  }
  0x57   :  { %s753_s17 = scalar_lea.hbm %s984_s4, 16 }
  0x58   :  { %p754_p12 = scmp.ne.s32.totalorder %s984_s4, %s753_s17  ;;  %p757_p13 = scmp.lt.u32.totalorder %s753_s17, %s984_s4 }
  0x5a   :  { %p759_p0 = pnand %p757_p13, %p754_p12 }
  0x5c   :  { %762 = shalt.err (!%p759_p0)
}
  0x5d   :  { %s763_s22 = scalar_lea.vmem %s68_s29, 16  ;;  %s767_s23 = scalar_lea.vmem %s68_s29, 32 }
  0x5e   :  { %p764_p1 = scmp.ne.s32.totalorder %s68_s29, %s763_s22  ;;  %p768_p2 = scmp.lt.s32.totalorder %s68_s29, %s68_s29 }
  0x5f   :  { %p769_p3 = scmp.lt.s32.totalorder %s767_s23, %s763_s22 }
  0x61   :  { %p770_p4 = por %p769_p3, %p768_p2 }
  0x63   :  { %p771_p5 = pnand %p770_p4, %p764_p1 }
  0x65   :  { %774 = shalt.err (!%p771_p5)
}
  0x66   :  { %70 = dma.hbm_to_vmem [thread:$0]  %s984_s4, 16, %s68_s29, [#allocation9]  }
  0x67   :  { %s839_s26 = smov [#allocation13]   ;;  %s775_s27 = scalar_lea.hbm %s986_s6, 16 }
  0x68   :  { %s89_s5 = sshll.u32 %s839_s26, 4  ;;  %p776_p6 = scmp.ne.s32.totalorder %s986_s6, %s775_s27  ;;  %s90_s5 = int_to_ptr.vmem [resolvable:$true] %s89_s5 }
  0x69   :  { %p779_p7 = scmp.lt.u32.totalorder %s775_s27, %s986_s6 }
  0x6b   :  { %p781_p8 = pnand %p779_p7, %p776_p6 }
  0x6d   :  { %784 = shalt.err (!%p781_p8)
}
  0x6e   :  { %s785_s11 = scalar_lea.vmem %s90_s5, 16  ;;  %s789_s4 = scalar_lea.vmem %s90_s5, 32 }
  0x6f   :  { %p786_p9 = scmp.ne.s32.totalorder %s90_s5, %s785_s11  ;;  %p790_p10 = scmp.lt.s32.totalorder %s90_s5, %s90_s5 }
  0x70   :  { %p791_p11 = scmp.lt.s32.totalorder %s789_s4, %s785_s11 }
  0x72   :  { %p792_p12 = por %p791_p11, %p790_p10 }
  0x74   :  { %p793_p13 = pnand %p792_p12, %p786_p9 }
  0x76   :  { %796 = shalt.err (!%p793_p13)
}
  0x77   :  { %92 = dma.hbm_to_vmem [thread:$0]  %s986_s6, 16, %s90_s5, [#allocation12]  }
  0x78   :  { %819 = dma.done.wait [#allocation3], 32  }
  0x79   :  { %820 = vsyncadd [#allocation3], 4294967264 }
  0x7a   :  { %821 = dma.done.wait [#allocation6], 544  }
  0x7b   :  { %822 = vsyncadd [#allocation6], 4294966752 }
  0x7c   :  { %823 = dma.done.wait [#allocation9], 2064  }
  0x7d   :  { %824 = vsyncadd [#allocation9], 4294965232 }
  0x7e   :  { %825 = dma.done.wait [#allocation12], 1040  }
  0x7f   :  { %826 = vsyncadd [#allocation12], 4294966256  ;;  %v840_v0 = vmov 0   ;;  %v613_v1 = vld [vmem:[#allocation5 + $0x4] ss:$8 sps:$4 sm:$0xff]   ;;  %vm153_vm0 = vcmask 261120   ;;  %v123_v29 = vlaneseq }
  0x80   :  { %189 = vmatprep.mubr.bf16.mxu0 %v840_v0  ;;  %v615_v2 = vld [vmem:[#allocation5] ss:$8 sps:$4 sm:$0xff]   ;;  %157 = vmatprep.subr.bf16.mxu0 %v613_v1  ;;  %v616_v3 = vld [vmem:[#allocation5 + $0x14] ss:$8 sps:$4 sm:$0xff]   ;;  %v618_v4 = vld [vmem:[#allocation5 + $0x10] ss:$8 sps:$4 sm:$0xff]  }
  0x81   :  { %v115_v5 = vld [vmem:[#allocation2] sm:$0x3]  ;;  %158 = vmatpush1.bf16.msra.mxu0 %v615_v2  ;;  %v619_v6 = vld [vmem:[#allocation8 + $0x40] sm:$0xff]   ;;  %v621_v8 = vld [vmem:[#allocation8 + $0x48] sm:$0xff]   ;;  %v841_v24 = vmov 0.0   ;;  %v124_v30 = vshrl.u32 %v123_v29, 7 }
  0x82   :  { %159 = vmatprep.subr.bf16.mxu0 %v616_v3  ;;  %v620_v7 = vld [vmem:[#allocation8] sm:$0xff]   ;;  %547 = vmatprep.subr.bf16.mxu1 %v619_v6  ;;  %v116_v9 = vpack.c.bf16 %v115_v5, %v115_v5  ;;  %v622_v10 = vld [vmem:[#allocation8 + $0x8] sm:$0xff]   ;;  %v623_v11 = vld [vmem:[#allocation8 + $0x50] sm:$0xff]   ;;  %vm842_vm1 = vmmov 0   ;;  %s843_s6 = smov [#allocation14]  }
  0x83   :  { %548 = vmatpush3.bf16.msra.mxu1 %v620_v7  ;;  %v624_v12 = vld [vmem:[#allocation8 + $0x10] sm:$0xff]   ;;  %v625_v13 = vld [vmem:[#allocation8 + $0x58] sm:$0xff]   ;;  %v627_v15 = vld [vmem:[#allocation8 + $0x60] sm:$0xff]   ;;  %v125_v31 = vsub.s32 0, %v124_v30  ;;  %v129_v33 = vsub.s32 1, %v124_v30  ;;  %s504_s13 = sshll.u32 %s843_s6, 4  ;;  %s505_s13 = int_to_ptr.vmem [resolvable:$true] %s504_s13 }
  0x84   :  { %549 = vmatprep.subr.bf16.mxu1 %v621_v8  ;;  %v626_v14 = vld [vmem:[#allocation8 + $0x18] sm:$0xff]   ;;  %v628_v16 = vld [vmem:[#allocation8 + $0x20] sm:$0xff]   ;;  %v629_v17 = vld [vmem:[#allocation8 + $0x68] sm:$0xff]   ;;  %s797_s14 = scalar_lea.vmem %s505_s13, 16  ;;  %s801_s0 = scalar_lea.vmem %s505_s13, 32 }
  0x85   :  { %160 = vmatpush1.bf16.msra.mxu0 %v618_v4  ;;  %v630_v18 = vld [vmem:[#allocation8 + $0x28] sm:$0xff]   ;;  %v631_v19 = vld [vmem:[#allocation8 + $0x70] sm:$0xff]   ;;  %v633_v21 = vld [vmem:[#allocation8 + $0x78] sm:$0xff]   ;;  %p798_p0 = scmp.ne.s32.totalorder %s505_s13, %s797_s14  ;;  %p802_p1 = scmp.lt.s32.totalorder %s505_s13, %s505_s13 }
  0x86   :  { %v632_v20 = vld [vmem:[#allocation8 + $0x30] sm:$0xff]   ;;  %v634_v22 = vld [vmem:[#allocation8 + $0x38] sm:$0xff]   ;;  %v635_v23 = vld [vmem:[#allocation11] sm:$0xff]   ;;  %578 = vmatprep.subr.bf16.mxu0 %v841_v24  ;;  %p803_p2 = scmp.lt.s32.totalorder %s801_s0, %s797_s14 }
  0x87   :  { %550 = vmatpush3.bf16.msra.mxu1 %v622_v10  ;;  %v636_v25 = vld [vmem:[#allocation11 + $0x8] sm:$0xff]   ;;  %v637_v26 = vld [vmem:[#allocation11 + $0x10] sm:$0xff]   ;;  %v638_v27 = vld [vmem:[#allocation11 + $0x18] sm:$0xff]  }
  0x88   :  { %520 = vmatmul.mubr.msk.bf16.vlgmr.msra.gmra.mrb[0].mxu0 %vm153_vm0, %v116_v9  ;;  %551 = vmatprep.subr.bf16.mxu1 %v623_v11  ;;  %v639_v28 = vld [vmem:[#allocation11 + $0x20] sm:$0xff]   ;;  %v121_v32 = vld [vmem:[#allocation7] sm:$0x3]  ;;  %v640_v50 = vld [vmem:[#allocation11 + $0x28] sm:$0xff]   ;;  %p804_p3 = por %p803_p2, %p802_p1 }
  0x89   :  { %579 = vmatpush3.bf16.msra.mxu0 %v635_v23  ;;  %v126_v34 = vrot.slane %v121_v32, %v125_v31  ;;  %v130_v35 = vrot.slane %v121_v32, %v129_v33  ;;  %v641_v51 = vld [vmem:[#allocation11 + $0x30] sm:$0xff]   ;;  %v642_v52 = vld [vmem:[#allocation11 + $0x38] sm:$0xff]   ;;  %594 = vmatprep.mubr.msk.bf16.mxu0 %vm842_vm1, %v841_v24  ;;  %v538_v0 = vld [vmem:[#allocation13] ss:$0 sm:$0xff] }
  0x8a   :  { %580 = vmatprep.subr.bf16.mxu0 %v841_v24  ;;  %v521_v54 = vld [vmem:[#allocation10] ss:$0 sm:$0xff]  ;;  %p805_p4 = pnand %p804_p3, %p798_p0 }
  0x8b   :  { %552 = vmatpush3.bf16.msra.mxu1 %v624_v12 }
  0x8c   :  { %553 = vmatprep.subr.bf16.mxu1 %v625_v13 }
  0x8d   :  { %581 = vmatpush3.bf16.msra.mxu0 %v636_v25 }
  0x8e   :  { %582 = vmatprep.subr.bf16.mxu0 %v841_v24 }
  0x8f   :  { %554 = vmatpush3.bf16.msra.mxu1 %v626_v14 }
  0x90   :  { %555 = vmatprep.subr.bf16.mxu1 %v627_v15 }
  0x91   :  { %583 = vmatpush3.bf16.msra.mxu0 %v637_v26 }
  0x92   :  { %584 = vmatprep.subr.bf16.mxu0 %v841_v24 }
  0x93   :  { %556 = vmatpush3.bf16.msra.mxu1 %v628_v16 }
  0x94   :  { %557 = vmatprep.subr.bf16.mxu1 %v629_v17 }
  0x95   :  { %585 = vmatpush3.bf16.msra.mxu0 %v638_v27 }
  0x96   :  { %586 = vmatprep.subr.bf16.mxu0 %v841_v24 }
  0x97   :  { %558 = vmatpush3.bf16.msra.mxu1 %v630_v18 }
  0x98   :  { %559 = vmatprep.subr.bf16.mxu1 %v631_v19 }
  0x99   :  { %587 = vmatpush3.bf16.msra.mxu0 %v639_v28 }
  0x9a   :  { %588 = vmatprep.subr.bf16.mxu0 %v841_v24 }
  0x9b   :  { %560 = vmatpush3.bf16.msra.mxu1 %v632_v20 }
  0x9c   :  { %561 = vmatprep.subr.bf16.mxu1 %v633_v21 }
  0x9d   :  { %589 = vmatpush3.bf16.msra.mxu0 %v640_v50 }
  0x9e   :  { %590 = vmatprep.subr.bf16.mxu0 %v841_v24 }
  0x9f   :  { %562 = vmatpush3.bf16.msra.mxu1 %v634_v22 }
  0xa1   :  { %591 = vmatpush3.bf16.msra.mxu0 %v641_v51 }
  0xa2   :  { %592 = vmatprep.subr.bf16.mxu0 %v841_v24 }
  0xa5   :  { %593 = vmatpush3.bf16.msra.mxu0 %v642_v52 }
 0x15b   :  { %v191_v36 = vpop.f32.mrb[0].mxu0 }
 0x15c   :  { %v192_v37 = vadd.f32 %v191_v36, %v126_v34  ;;  %v193_v38 = vpop.f32.mrb[1].mxu0 }
 0x15d   :  { %v194_v39 = vadd.f32 %v193_v38, %v130_v35  ;;  %v195_v40 = vpop.f32.mrb[2].mxu0 }
 0x15e   :  { %v198_v41 = vmul.f32 0.25, %v192_v37  ;;  %v196_v42 = vpop.f32.mrb[3].mxu0 }
 0x15f   :  { %v199_v43 = vmul.f32 0.25, %v194_v39 }
 0x160   :  { %v200_v44 = vadd.f32 0.5, %v198_v41 }
 0x161   :  { %v201_v45 = vadd.f32 0.5, %v199_v43 }
 0x162   :  { %v202_v46 = vmul.f32 %v200_v44, %v192_v37 }
 0x163   :  { %v203_v47 = vmul.f32 %v201_v45, %v194_v39 }
 0x164   :  { %v204_v49 = vpack.c.bf16 %v202_v46, %v202_v46 }
 0x165   :  { %v205_v48 = vpack.c.bf16 %v203_v47, %v203_v47 }
 0x167   :  { %373 = vmatprep.mubr.bf16.mxu1 %v205_v48 }
 0x168   :  { %374 = vmatmul.mubr.bf16.vlgmr.msra.gmra.mrb[0].mxu1 %v204_v49 }
 0x23b   :  { %v563_v53 = vpop.f32.mrb[0].mxu1 }
 0x23c   :  { %v564_v55 = vpop.f32.mrb[1].mxu1 }
 0x23d   :  { %v565_v56 = vadd.f32 %v564_v55, %v563_v53  ;;  %v566_v57 = vpop.f32.mrb[2].mxu1 }
 0x23e   :  { %v567_v58 = vpop.f32.mrb[3].mxu1 }
 0x23f   :  { %v376_v59 = vadd.f32 %v565_v56, %v521_v54 }
 0x241   :  { %v381_v60 = vmul.f32 0.25, %v376_v59 }
 0x243   :  { %v382_v61 = vadd.f32 0.5, %v381_v60 }
 0x245   :  { %v383_v62 = vmul.f32 %v382_v61, %v376_v59 }
 0x247   :  { %v384_v63 = vpack.c.bf16 %v383_v62, %v383_v62 }
 0x249   :  { %595 = vmatmul.mubr.bf16.vlgmr.msra.gmra.mrb[4].mxu0 %v384_v63 }
 0x31c   :  { %v490_v1 = vpop.f32.mrb[4].mxu0 }
 0x31d   :  { %v491_v2 = vadd.f32 %v538_v0, %v490_v1  ;;  %v596_v3 = vpop.f32.mrb[5].mxu0 }
 0x31e   :  { %v493_v4 = vpop.f32.mrb[6].mxu0 }
 0x31f   :  { %v496_v5 = vpack.c.bf16 %v491_v2, %v491_v2  ;;  %v597_v6 = vpop.f32.mrb[7].mxu0 }
 0x321   :  { %497 = vst [vmem:[#allocation14] sm:$0x1] %v496_v5 }
 0x322   :  { %808 = shalt.err (!%p805_p4)
}
 0x323   :  { %s809_s3 = scalar_lea.hbm %s987_s7, 16 }
 0x324   :  { %p810_p5 = scmp.ne.s32.totalorder %s987_s7, %s809_s3  ;;  %p813_p6 = scmp.lt.u32.totalorder %s809_s3, %s987_s7 }
 0x326   :  { %p815_p7 = pnand %p813_p6, %p810_p5 }
 0x328   :  { %818 = shalt.err (!%p815_p7)
}
 0x329   :  { %507 = dma.vmem_to_hbm [thread:$0]  %s505_s13, 16, %s987_s7, [#allocation4]  }
 0x32a   :  { %827 = dma.done.wait [#allocation4], 16  }
 0x32b   :  { %828 = vsyncadd [#allocation4], 4294967280 }
 0x32c   :  { %511 = vsyncpa [#allocation3], 1 }
 0x32d   :  { %512 = vsyncpa [#allocation6], 1 }
 0x32e   :  { %513 = vsyncpa [#allocation9], 1 }
 0x32f   :  { %514 = vsyncpa [#allocation12], 1 }
 0x330   :  { %515 = vsyncpa [#allocation4], 1 }

</bundles_post_ra>
